<compile_context>
chip_gen: v5e
topology: v5e:2x2
jax: 0.10.0
libtpu: 0.0.40
codegen_flags: <defaults>
</compile_context>

<pallas_src>
import math
from functools import partial

import jax
import jax.numpy as jnp
from jax import lax
from jax.experimental import pallas as pl
from jax.experimental.pallas import tpu as pltpu


_TILE_VMEM_BUDGET = 20 * 1024 * 1024   # target bytes for the pipelined blocks + temps
_MAX_TILE_ROWS = 1024                  # 1024 rows x 128 lanes = 131072 pixels / step


def _make_ce_kernel(num_classes, tile_rows, hw, log_thresh, need_mask):
    """Per-pixel CE + fused OHEM stats. Classes leading, pixels on (sublane, lane)."""

    def kernel(logits_ref, labels_ref, loss_ref, cnt_ref, hsum_ref):
        # logits_ref: (1, C, tile_rows, 128)
        # labels_ref: (1, tile_rows, 128) int32
        # loss_ref  : (1, tile_rows, 128) f32
        # cnt_ref   : (1, 1, 1, 1) int32      hsum_ref: (1, 1, 1, 1) f32
        y = labels_ref[0]

        # Pass 1 over the class slabs: fused running max + label-logit pick
        # (no materialized (C, R, 128) iota; one compare/select per class).
        x0 = logits_ref[0, 0]
        zeros = jnp.zeros_like(x0)
        m = x0
        picked = jnp.where(y == 0, x0, zeros)
        for c in range(1, num_classes):
            xc = logits_ref[0, c]
            m = jnp.maximum(m, xc)
            picked = picked + jnp.where(y == c, xc, zeros)

        # Pass 2: exp-sum accumulation in f32 (numerically-stable log-sum-exp).
        m32 = m.astype(jnp.float32)
        s = jnp.exp(logits_ref[0, 0].astype(jnp.float32) - m32)
        for c in range(1, num_classes):
            s = s + jnp.exp(logits_ref[0, c].astype(jnp.float32) - m32)

        loss = (m32 + jnp.log(s)) - picked.astype(jnp.float32)
        loss_ref[0] = loss                               # lane-dense full-width store

        # Fused OHEM statistics: count / sum of losses above the threshold.
        hard = loss > log_thresh
        if need_mask:
            # Mask out padded pixels / garbage rows of a ragged boundary tile.
            t = pl.program_id(1)
            row = lax.broadcasted_iota(jnp.int32, loss.shape, 0) + t * tile_rows
            col = lax.broadcasted_iota(jnp.int32, loss.shape, 1)
            hard = jnp.logical_and(hard, (row * 128 + col) < hw)
        cnt_ref[...] = jnp.sum(hard.astype(jnp.int32)).reshape(1, 1, 1, 1)
        hsum_ref[...] = jnp.sum(jnp.where(hard, loss, 0.0)).reshape(1, 1, 1, 1)

    return kernel


def _pick_tile_rows(rows, per_row_bytes, sublane, want_tiles):
    """Largest VMEM-budgeted tile_rows that is a multiple of `sublane` or == rows."""
    cap = min(max(_TILE_VMEM_BUDGET // per_row_bytes, sublane), _MAX_TILE_ROWS)
    if rows <= sublane:
        return rows                                      # block == full dim (allowed)
    target = min(rows, cap, max(-(-rows // want_tiles), sublane))
    if target == rows:
        return rows                                      # single full-extent tile
    return max((target // sublane) * sublane, sublane)


def _ce_with_stats(logits_nchw, labels_nhw, log_thresh):
    """Per-pixel CE (flattened) + fused (count, sum) of losses above log_thresh."""
    N, C, H, W = logits_nchw.shape
    HW = H * W
    in_bytes = jnp.dtype(logits_nchw.dtype).itemsize
    sublane = max(8, 32 // max(in_bytes, 1))             # 8 f32, 16 bf16

    x = logits_nchw.reshape(N, C, HW)                    # free reshape, no transpose
    y = labels_nhw.reshape(N, HW).astype(jnp.int32)

    HWp = -(-HW // 128) * 128
    if HWp != HW:
        # TODO(synk): ragged HW (HW % 128 != 0) still pads the full logits tensor
        # (one extra HBM copy); a zero-copy path would need a flat-pixel layout or
        # a second remainder kernel. Common segmentation resolutions avoid this.
        x = jnp.pad(x, ((0, 0), (0, 0), (0, HWp - HW)))
        y = jnp.pad(y, ((0, 0), (0, HWp - HW)))

    rows = HWp // 128
    x = x.reshape(N, C, rows, 128)                       # classes leading
    y = y.reshape(N, rows, 128)

    # Double-buffered logits + labels/loss blocks + f32 elementwise temporaries.
    per_row_bytes = 128 * (2 * C * in_bytes + 48)
    want_tiles = 2 if N == 1 else 1                      # keep >=2 grid steps (megacore)
    tile_rows = _pick_tile_rows(rows, per_row_bytes, sublane, want_tiles)
    num_tiles = -(-rows // tile_rows)
    need_mask = (HWp != HW) or (rows % tile_rows != 0)

    kernel = _make_ce_kernel(C, tile_rows, HW, log_thresh, need_mask)

    vmem_need = (2 * tile_rows * 128 * (C * in_bytes + 8)   # pipelined blocks
                 + 12 * tile_rows * 128 * 4                 # elementwise temporaries
                 + (4 << 20))
    vmem_limit = int(min(64 << 20, max(32 << 20, vmem_need)))

    loss, cnt, hsum = pl.pallas_call(
        kernel,
        out_shape=(
            jax.ShapeDtypeStruct((N, rows, 128), jnp.float32),
            jax.ShapeDtypeStruct((N, num_tiles, 1, 1), jnp.int32),
            jax.ShapeDtypeStruct((N, num_tiles, 1, 1), jnp.float32),
        ),
        grid_spec=pltpu.PrefetchScalarGridSpec(
            num_scalar_prefetch=0,
            grid=(N, num_tiles),
            in_specs=[
                pl.BlockSpec((1, C, tile_rows, 128), lambda n, t: (n, 0, t, 0)),
                pl.BlockSpec((1, tile_rows, 128), lambda n, t: (n, t, 0)),
            ],
            out_specs=[
                pl.BlockSpec((1, tile_rows, 128), lambda n, t: (n, t, 0)),
                pl.BlockSpec((1, 1, 1, 1), lambda n, t: (n, t, 0, 0)),
                pl.BlockSpec((1, 1, 1, 1), lambda n, t: (n, t, 0, 0)),
            ],
        ),
        compiler_params=pltpu.CompilerParams(
            dimension_semantics=("parallel", "parallel"),
            vmem_limit_bytes=vmem_limit,
        ),
    )(x, y)

    loss_flat = loss.reshape(N, HWp)[:, :HW].reshape(-1)
    return loss_flat, jnp.sum(cnt), jnp.sum(hsum)


def _topk_mean(loss_flat, k):
    """Exact mean of the k (>=1) largest entries without sort / top_k.

    Bit-pattern binary search (loss >= 0 => f32 bits are monotone) finds the
    k-th largest value exactly in 31 count passes; ties are filled analytically.
    """
    vals = jnp.maximum(loss_flat, 0.0)
    bits = lax.bitcast_convert_type(vals, jnp.int32)

    def body(_, lohi):
        lo, hi = lohi
        mid = lo + (hi - lo) // 2
        ge = jnp.sum((bits >= mid).astype(jnp.int32)) >= k
        return (jnp.where(ge, mid, lo), jnp.where(ge, hi, mid))

    lo, _ = lax.fori_loop(0, 31, body, (jnp.int32(0), jnp.int32(0x7F800001)))
    kth = lax.bitcast_convert_type(lo, jnp.float32)

    gt = vals > kth
    cnt_gt = jnp.sum(gt.astype(jnp.int32))
    sum_gt = jnp.sum(jnp.where(gt, vals, 0.0))
    return (sum_gt + (k - cnt_gt).astype(jnp.float32) * kth) / jnp.float32(k)


@partial(jax.jit, static_argnames=("thresh", "n_min"))
def ohem_ce_loss(logits, labels, *, thresh=0.7, n_min=None):
    """JAX/Pallas equivalent of OhemCELoss.forward(logits, labels)."""
    N, C, H, W = logits.shape
    M = N * H * W
    if n_min is None:
        n_min = M // 16
    n_min = max(1, min(int(n_min), M))       # guard k=0 / k>M degenerate cases

    log_thresh = -math.log(float(thresh))    # module stores thresh = -log(thresh_prob)

    # TODO(synk): ignore_index is not handled; the reference module constructs
    # nn.CrossEntropyLoss without ignore_index.
    loss_flat, hard_cnt, hard_sum = _ce_with_stats(logits, labels, log_thresh)

    # loss_sorted[n_min] > thresh  <=>  count(loss > thresh) > n_min
    return lax.cond(
        hard_cnt > n_min,
        lambda: hard_sum / hard_cnt.astype(jnp.float32),   # mean of losses > thresh
        lambda: _topk_mean(loss_flat, n_min),              # mean of top n_min losses
    )


if __name__ == "__main__":
    key = jax.random.PRNGKey(0)
    k1, k2 = jax.random.split(key)

    N, C, H, W = 2, 4, 16, 16
    logits = jax.random.normal(k1, (N, C, H, W), dtype=jnp.float32)
    labels = jax.random.randint(k2, (N, H, W), 0, C, dtype=jnp.int32)

    out = ohem_ce_loss(logits, labels, thresh=0.7, n_min=(N * H * W) // 16)
    out = jax.block_until_ready(out)

    assert out.shape == ()
    assert bool(jnp.isfinite(out))
    print("KERNEL_OK")
</pallas_src>

<mosaic_0001>
module attributes {stable_mosaic.version = 11 : i64} {
  func.func @kernel(%arg0: i32, %arg1: i32, %arg2: memref<1x4x2x128xf32, #tpu.memory_space<vmem>>, %arg3: memref<1x2x128xi32, #tpu.memory_space<vmem>>, %arg4: memref<1x2x128xf32, #tpu.memory_space<vmem>>, %arg5: memref<1x1x1x1xi32, #tpu.memory_space<vmem>>, %arg6: memref<1x1x1x1xf32, #tpu.memory_space<vmem>>) attributes {dimension_semantics = [#tpu.dimension_semantics<parallel>, #tpu.dimension_semantics<parallel>], iteration_bounds = array<i64: 2, 1>, scalar_prefetch = 0 : i64, scratch_operands = 0 : i64, tpu.core_type = #tpu.core_type<tc>, window_params = [{transform_indices = @transform_0, window_bounds = array<i64: 1, 4, 2, 128>}, {transform_indices = @transform_1, window_bounds = array<i64: 1, 2, 128>}, {transform_indices = @transform_2, window_bounds = array<i64: 1, 2, 128>}, {transform_indices = @transform_3, window_bounds = array<i64: 1, 1, 1, 1>}, {transform_indices = @transform_4, window_bounds = array<i64: 1, 1, 1, 1>}]} {
    %c0 = arith.constant 0 : index
    %c0_0 = arith.constant 0 : index
    %c0_1 = arith.constant 0 : index
    %0 = vector.load %arg3[%c0, %c0_0, %c0_1] : memref<1x2x128xi32, #tpu.memory_space<vmem>>, vector<1x2x128xi32>
    %1 = vector.shape_cast %0 : vector<1x2x128xi32> to vector<2x128xi32>
    %c0_2 = arith.constant 0 : index
    %c0_3 = arith.constant 0 : index
    %c0_4 = arith.constant 0 : index
    %c0_5 = arith.constant 0 : index
    %2 = vector.load %arg2[%c0_2, %c0_3, %c0_4, %c0_5] : memref<1x4x2x128xf32, #tpu.memory_space<vmem>>, vector<1x1x2x128xf32>
    %3 = vector.shape_cast %2 : vector<1x1x2x128xf32> to vector<2x128xf32>
    %cst = arith.constant 0.000000e+00 : f32
    %4 = vector.broadcast %cst : f32 to vector<2x128xf32>
    %c0_i32 = arith.constant 0 : i32
    %5 = vector.broadcast %c0_i32 : i32 to vector<2x128xi32>
    %6 = arith.cmpi eq, %1, %5 : vector<2x128xi32>
    %7 = arith.select %6, %3, %4 : vector<2x128xi1>, vector<2x128xf32>
    %c0_6 = arith.constant 0 : index
    %c1 = arith.constant 1 : index
    %c0_7 = arith.constant 0 : index
    %c0_8 = arith.constant 0 : index
    %8 = vector.load %arg2[%c0_6, %c1, %c0_7, %c0_8] : memref<1x4x2x128xf32, #tpu.memory_space<vmem>>, vector<1x1x2x128xf32>
    %9 = vector.shape_cast %8 : vector<1x1x2x128xf32> to vector<2x128xf32>
    %10 = arith.maximumf %3, %9 : vector<2x128xf32>
    %c1_i32 = arith.constant 1 : i32
    %11 = vector.broadcast %c1_i32 : i32 to vector<2x128xi32>
    %12 = arith.cmpi eq, %1, %11 : vector<2x128xi32>
    %13 = arith.select %12, %9, %4 : vector<2x128xi1>, vector<2x128xf32>
    %14 = arith.addf %7, %13 : vector<2x128xf32>
    %c0_9 = arith.constant 0 : index
    %c2 = arith.constant 2 : index
    %c0_10 = arith.constant 0 : index
    %c0_11 = arith.constant 0 : index
    %15 = vector.load %arg2[%c0_9, %c2, %c0_10, %c0_11] : memref<1x4x2x128xf32, #tpu.memory_space<vmem>>, vector<1x1x2x128xf32>
    %16 = vector.shape_cast %15 : vector<1x1x2x128xf32> to vector<2x128xf32>
    %17 = arith.maximumf %10, %16 : vector<2x128xf32>
    %c2_i32 = arith.constant 2 : i32
    %18 = vector.broadcast %c2_i32 : i32 to vector<2x128xi32>
    %19 = arith.cmpi eq, %1, %18 : vector<2x128xi32>
    %20 = arith.select %19, %16, %4 : vector<2x128xi1>, vector<2x128xf32>
    %21 = arith.addf %14, %20 : vector<2x128xf32>
    %c0_12 = arith.constant 0 : index
    %c3 = arith.constant 3 : index
    %c0_13 = arith.constant 0 : index
    %c0_14 = arith.constant 0 : index
    %22 = vector.load %arg2[%c0_12, %c3, %c0_13, %c0_14] : memref<1x4x2x128xf32, #tpu.memory_space<vmem>>, vector<1x1x2x128xf32>
    %23 = vector.shape_cast %22 : vector<1x1x2x128xf32> to vector<2x128xf32>
    %24 = arith.maximumf %17, %23 : vector<2x128xf32>
    %c3_i32 = arith.constant 3 : i32
    %25 = vector.broadcast %c3_i32 : i32 to vector<2x128xi32>
    %26 = arith.cmpi eq, %1, %25 : vector<2x128xi32>
    %27 = arith.select %26, %23, %4 : vector<2x128xi1>, vector<2x128xf32>
    %28 = arith.addf %21, %27 : vector<2x128xf32>
    %c0_15 = arith.constant 0 : index
    %c0_16 = arith.constant 0 : index
    %c0_17 = arith.constant 0 : index
    %c0_18 = arith.constant 0 : index
    %29 = vector.load %arg2[%c0_15, %c0_16, %c0_17, %c0_18] : memref<1x4x2x128xf32, #tpu.memory_space<vmem>>, vector<1x1x2x128xf32>
    %30 = vector.shape_cast %29 : vector<1x1x2x128xf32> to vector<2x128xf32>
    %31 = arith.subf %30, %24 : vector<2x128xf32>
    %32 = math.exp %31 : vector<2x128xf32>
    %c0_19 = arith.constant 0 : index
    %c1_20 = arith.constant 1 : index
    %c0_21 = arith.constant 0 : index
    %c0_22 = arith.constant 0 : index
    %33 = vector.load %arg2[%c0_19, %c1_20, %c0_21, %c0_22] : memref<1x4x2x128xf32, #tpu.memory_space<vmem>>, vector<1x1x2x128xf32>
    %34 = vector.shape_cast %33 : vector<1x1x2x128xf32> to vector<2x128xf32>
    %35 = arith.subf %34, %24 : vector<2x128xf32>
    %36 = math.exp %35 : vector<2x128xf32>
    %37 = arith.addf %32, %36 : vector<2x128xf32>
    %c0_23 = arith.constant 0 : index
    %c2_24 = arith.constant 2 : index
    %c0_25 = arith.constant 0 : index
    %c0_26 = arith.constant 0 : index
    %38 = vector.load %arg2[%c0_23, %c2_24, %c0_25, %c0_26] : memref<1x4x2x128xf32, #tpu.memory_space<vmem>>, vector<1x1x2x128xf32>
    %39 = vector.shape_cast %38 : vector<1x1x2x128xf32> to vector<2x128xf32>
    %40 = arith.subf %39, %24 : vector<2x128xf32>
    %41 = math.exp %40 : vector<2x128xf32>
    %42 = arith.addf %37, %41 : vector<2x128xf32>
    %c0_27 = arith.constant 0 : index
    %c3_28 = arith.constant 3 : index
    %c0_29 = arith.constant 0 : index
    %c0_30 = arith.constant 0 : index
    %43 = vector.load %arg2[%c0_27, %c3_28, %c0_29, %c0_30] : memref<1x4x2x128xf32, #tpu.memory_space<vmem>>, vector<1x1x2x128xf32>
    %44 = vector.shape_cast %43 : vector<1x1x2x128xf32> to vector<2x128xf32>
    %45 = arith.subf %44, %24 : vector<2x128xf32>
    %46 = math.exp %45 : vector<2x128xf32>
    %47 = arith.addf %42, %46 : vector<2x128xf32>
    %48 = math.log %47 : vector<2x128xf32>
    %49 = arith.addf %24, %48 : vector<2x128xf32>
    %50 = arith.subf %49, %28 : vector<2x128xf32>
    %c0_31 = arith.constant 0 : index
    %c0_32 = arith.constant 0 : index
    %c0_33 = arith.constant 0 : index
    %51 = vector.load %arg4[%c0_31, %c0_32, %c0_33] : memref<1x2x128xf32, #tpu.memory_space<vmem>>, vector<1x2x128xf32>
    %52 = vector.shape_cast %51 : vector<1x2x128xf32> to vector<2x128xf32>
    %53 = vector.shape_cast %50 : vector<2x128xf32> to vector<1x2x128xf32>
    tpu.vector_store %arg4[%c0_31, %c0_32, %c0_33], %53 {strides = array<i32>} : memref<1x2x128xf32, #tpu.memory_space<vmem>>, vector<1x2x128xf32>,
    %cst_34 = arith.constant 0.356674939 : f32
    %54 = vector.broadcast %cst_34 : f32 to vector<2x128xf32>
    %55 = arith.cmpf ogt, %50, %54 : vector<2x128xf32>
    %56 = arith.extui %55 : vector<2x128xi1> to vector<2x128xi32>
    %57 = vector.shape_cast %56 : vector<2x128xi32> to vector<1x2x128xi32>
    %cst_35 = arith.constant dense<0> : vector<1xi32>
    %58 = vector.multi_reduction <add>, %57, %cst_35 [1, 2] : vector<1x2x128xi32> to vector<1xi32>
    %59 = vector.shape_cast %58 : vector<1xi32> to vector<1x1x1xi32>
    %60 = vector.extract %59[0, 0, 0] : i32 from vector<1x1x1xi32>
    %61 = vector.broadcast %60 : i32 to vector<1x1x1x1xi32>
    %c0_36 = arith.constant 0 : index
    %c0_37 = arith.constant 0 : index
    %c0_38 = arith.constant 0 : index
    %c0_39 = arith.constant 0 : index
    %62 = vector.load %arg5[%c0_36, %c0_37, %c0_38, %c0_39] : memref<1x1x1x1xi32, #tpu.memory_space<vmem>>, vector<1x1x1x1xi32>
    tpu.vector_store %arg5[%c0_36, %c0_37, %c0_38, %c0_39], %61 {strides = array<i32>} : memref<1x1x1x1xi32, #tpu.memory_space<vmem>>, vector<1x1x1x1xi32>,
    %cst_40 = arith.constant 0.000000e+00 : f32
    %63 = vector.broadcast %cst_40 : f32 to vector<2x128xf32>
    %64 = arith.select %55, %50, %63 : vector<2x128xi1>, vector<2x128xf32>
    %65 = vector.shape_cast %64 : vector<2x128xf32> to vector<1x2x128xf32>
    %cst_41 = arith.constant dense<0.000000e+00> : vector<1xf32>
    %66 = vector.multi_reduction <add>, %65, %cst_41 [1, 2] : vector<1x2x128xf32> to vector<1xf32>
    %67 = vector.shape_cast %66 : vector<1xf32> to vector<1x1x1xf32>
    %68 = vector.extract %67[0, 0, 0] : f32 from vector<1x1x1xf32>
    %69 = vector.broadcast %68 : f32 to vector<1x1x1x1xf32>
    %c0_42 = arith.constant 0 : index
    %c0_43 = arith.constant 0 : index
    %c0_44 = arith.constant 0 : index
    %c0_45 = arith.constant 0 : index
    %70 = vector.load %arg6[%c0_42, %c0_43, %c0_44, %c0_45] : memref<1x1x1x1xf32, #tpu.memory_space<vmem>>, vector<1x1x1x1xf32>
    tpu.vector_store %arg6[%c0_42, %c0_43, %c0_44, %c0_45], %69 {strides = array<i32>} : memref<1x1x1x1xf32, #tpu.memory_space<vmem>>, vector<1x1x1x1xf32>,
    return
  }
  func.func @transform_0(%arg0: i32, %arg1: i32) -> (i32, i32, i32, i32) {
    %c0_i32 = arith.constant 0 : i32
    %c0_i32_0 = arith.constant 0 : i32
    %c0_i32_1 = arith.constant 0 : i32
    return %arg0, %c0_i32, %arg1, %c0_i32_0 : i32, i32, i32, i32
  }
  func.func @transform_1(%arg0: i32, %arg1: i32) -> (i32, i32, i32) {
    %c0_i32 = arith.constant 0 : i32
    %c0_i32_0 = arith.constant 0 : i32
    return %arg0, %arg1, %c0_i32 : i32, i32, i32
  }
  func.func @transform_2(%arg0: i32, %arg1: i32) -> (i32, i32, i32) {
    %c0_i32 = arith.constant 0 : i32
    %c0_i32_0 = arith.constant 0 : i32
    return %arg0, %arg1, %c0_i32 : i32, i32, i32
  }
  func.func @transform_3(%arg0: i32, %arg1: i32) -> (i32, i32, i32, i32) {
    %c0_i32 = arith.constant 0 : i32
    %c0_i32_0 = arith.constant 0 : i32
    %c0_i32_1 = arith.constant 0 : i32
    return %arg0, %arg1, %c0_i32, %c0_i32_0 : i32, i32, i32, i32
  }
  func.func @transform_4(%arg0: i32, %arg1: i32) -> (i32, i32, i32, i32) {
    %c0_i32 = arith.constant 0 : i32
    %c0_i32_0 = arith.constant 0 : i32
    %c0_i32_1 = arith.constant 0 : i32
    return %arg0, %arg1, %c0_i32, %c0_i32_0 : i32, i32, i32, i32
  }
}

</mosaic_0001>

<bundles_post_ra>
// kernel: ohem_ce_loss.1
= control target key start
LH: loop header
LB: loop body
LE: loop exit
PB: predicated region body
PF: predicated region fallthrough
CT: control target
= control target key end

     0   :  { %s635_s15 = smov 0   ;;  %s637_s16 = smov 0   ;;  %s687_s0 = inlined_call_operand.vmem [shape: f32[2,4,2,128], index: 0, kind: input, shape index: {}]   ;;  %s688_s1 = inlined_call_operand.vmem [shape: s32[2,2,128], index: 1, kind: input, shape index: {}]   ;;  %s689_s2 = inlined_call_operand.vmem [shape: f32[2,2,128], index: 2, kind: output, shape index: {0}]   ;;  %s690_s3 = inlined_call_operand.vmem [shape: s32[2,1,1,1], index: 3, kind: output, shape index: {1}]   ;;  %s691_s4 = inlined_call_operand.vmem [shape: f32[2,1,1,1], index: 4, kind: output, shape index: {2}]  }
   0x1   :  { %s639_s17 = smov 0  }
   0x2 LB: > { %s27_s18 = sadd.s32 1, %s603_s16  ;;  %p535_p0 = scmp.ge.s32.totalorder %s607_s17, 1  ;;  %s607_s17 = sphi %s639_s17, %s15_s17   ;;  %s603_s16 = sphi %s637_s16, %s693_s16   ;;  %s599_s15 = sphi %s635_s15, %s692_s15  }
   0x3   : > { %p29_p1 = scmp.ge.s32.totalorder %s27_s18, 2  ;;  %p204_p2 = scmp.lt.s32.totalorder %s607_s17, 3 }
   0x5   : > { %s695_s18 = smov (%p29_p1, %s27_s18), 0  ;;  %p205_p3 = pnand %p535_p0, %p204_p2 }
   0x6   : > { %p254_p4 = scmp.lt.s32.totalorder (!%p205_p3), %s599_s15, 1 }
   0x7   : > { %208 = sbr.rel (%p205_p3) target bundleno = 253 (0xfd), region = 28 }
   0xc   : > { %s697_s15 = smov (!%p254_p4, %s599_s15), 1  ;;  %vm332_vm4 = vcmask 1041408   ;;  %v609_v34 = vmov 0   ;;  %vm354_vm6 = vcmask 0  }
   0xd   : > { %s545_s19 = sshll.u32 %s697_s15, 3  ;;  %s538_s23 = sshll.u32 %s697_s15, 1 }
   0xe   : > { %s261_s22 = scalar_lea.vmem %s687_s0, %s545_s19  ;;  %s268_s26 = scalar_lea.vmem %s688_s1, %s538_s23 }
   0xf   : > { %v289_v0 = vld [vmem:[%s261_s22] sm:$0x3]  ;;  %v540_v1 = vld [vmem:[%s261_s22 + $0x2] sm:$0x3]  ;;  %v541_v3 = vld [vmem:[%s261_s22 + $0x4] sm:$0x3]  ;;  %s275_s29 = scalar_lea.vmem %s689_s2, %s538_s23  ;;  %s281_s6 = scalar_lea.vmem %s690_s3, %s697_s15 }
  0x10   : > { %v294_v2 = vmax.f32 %v289_v0, %v540_v1  ;;  %v542_v4 = vld [vmem:[%s261_s22 + $0x6] sm:$0x3]  ;;  %v288_v15 = vld [vmem:[%s268_s26] sm:$0x3]  ;;  %s287_s10 = scalar_lea.vmem %s691_s4, %s697_s15 }
  0x11   : > { %vm290_vm0 = vcmp.eq.s32.totalorder %v288_v15, 0  ;;  %vm295_vm1 = vcmp.eq.s32.totalorder %v288_v15, 1  ;;  %vm301_vm2 = vcmp.eq.s32.totalorder %v288_v15, 2  ;;  %vm307_vm3 = vcmp.eq.s32.totalorder %v288_v15, 3 }
  0x12   : > { %v300_v5 = vmax.f32 %v294_v2, %v541_v3  ;;  %v291_v21 = vsel %vm290_vm0, %v289_v0, 0.0  ;;  %v296_v22 = vsel %vm295_vm1, %v540_v1, 0.0  ;;  %v302_v26 = vsel %vm301_vm2, %v541_v3, 0.0 }
  0x13   : > { %v297_v25 = vadd.f32 %v296_v22, %v291_v21  ;;  %v308_v28 = vsel %vm307_vm3, %v542_v4, 0.0 }
  0x14   : > { %v306_v6 = vmax.f32 %v300_v5, %v542_v4 }
  0x15   : > { %v303_v27 = vadd.f32 %v302_v26, %v297_v25 }
  0x16   : > { %v310_v7 = vsub.f32 %v289_v0, %v306_v6  ;;  %v313_v8 = vsub.f32 %v540_v1, %v306_v6  ;;  %v317_v9 = vsub.f32 %v541_v3, %v306_v6  ;;  %v321_v10 = vsub.f32 %v542_v4, %v306_v6 }
  0x17   : > { %v309_v30 = vadd.f32 %v308_v28, %v303_v27 }
  0x18   : > { %v311_v11 = vmul.f32 1.442695, %v310_v7  ;;  %v314_v12 = vmul.f32 1.442695, %v313_v8  ;;  %v318_v13 = vmul.f32 1.442695, %v317_v9 }
  0x19   : > { %v322_v14 = vmul.f32 1.442695, %v321_v10 }
  0x1a   : > { %575 = vpow2.f32 %v311_v11 }
  0x1b   : > { %577 = vpow2.f32 %v314_v12 }
  0x1c   : > { %579 = vpow2.f32 %v318_v13 }
  0x1d   : > { %581 = vpow2.f32 %v322_v14 }
  0x20   : > { %v576_v16 = vpop.eup %575 }
  0x21   : > { %v578_v17 = vpop.eup %577 }
  0x22   : > { %v580_v18 = vpop.eup %579  ;;  %v316_v19 = vadd.f32 %v578_v17, %v576_v16 }
  0x23   : > { %v582_v20 = vpop.eup %581 }
  0x24   : > { %v320_v23 = vadd.f32 %v580_v18, %v316_v19 }
  0x26   : > { %v324_v24 = vadd.f32 %v582_v20, %v320_v23 }
  0x28   : > { %583 = vlog2.f32 %v324_v24 }
  0x2e   : > { %v584_v29 = vpop.eup %583 }
  0x2f   : > { %v326_v31 = vmul.f32 0.6931472, %v584_v29 }
  0x31   : > { %v327_v32 = vadd.f32 %v326_v31, %v306_v6 }
  0x33   : > { %v328_v33 = vsub.f32 %v327_v32, %v309_v30 }
  0x35   : > { %vm330_vm5 = vcmp.gt.f32.partialorder %v328_v33, 0.35667494  ;;  %329 = vst [vmem:[%s275_s29] sm:$0x3] %v328_v33 }
  0x36   : > { %v331_v35 = vsel %vm330_vm5, 1, %v609_v34  ;;  %v356_v36 = vsel %vm330_vm5, %v328_v33, 0.0 }
  0x37   : > { %v333_v37 = vsel %vm332_vm4, %v331_v35, 0  ;;  %v357_v38 = vsel %vm332_vm4, %v356_v36, 0.0 }
  0x38   : > { %v335_v39 = vshrl.u32 %v333_v37, 16  ;;  %358 = vadd.xlane.f32.xlu1 %v357_v38  ;;  %v334_v41 = vand.u32 65535, %v333_v37 }
  0x3a   : > { %v337_v40 = vcvt.s32.f32 %v335_v39  ;;  %v336_v42 = vcvt.s32.f32 %v334_v41 }
  0x3c   : > { %340 = vadd.xlane.f32.xlu0 %v337_v40 }
  0x44   : > { %338 = vadd.xlane.f32.xlu0 %v336_v42 }
  0xab   : > { %v359_v44 = vpop.xlane.xlu1 %358 }
  0xac   : > { %v360_v45 = vrot.slane %v359_v44, 4 }
  0xae   : > { %v361_v47 = vadd.f32 %v360_v45, %v359_v44 }
  0xaf   : > { %v341_v43 = vpop.xlane.xlu0 %340 }
  0xb0   : > { %v343_v46 = vcvt.f32.s32 %v341_v43  ;;  %v362_v52 = vrot.slane %v361_v47, 2 }
  0xb2   : > { %v344_v49 = vshll.u32 %v343_v46, 16  ;;  %v363_v55 = vadd.f32 %v362_v52, %v361_v47 }
  0xb4   : > { %v364_v58 = vrot.slane %v363_v55, 1 }
  0xb6   : > { %v365_v61 = vadd.f32 %v364_v58, %v363_v55 }
  0xb7   : > { %v339_v48 = vpop.xlane.xlu0 %338 }
  0xb8   : > { %v342_v50 = vcvt.f32.s32 %v339_v48 }
  0xba   : > { %v345_v51 = vadd.s32 %v344_v49, %v342_v50 }
  0xbc   : > { %v346_v53 = vrot.slane %v345_v51, 4 }
  0xbe   : > { %v347_v54 = vadd.s32 %v346_v53, %v345_v51 }
  0xc0   : > { %v348_v56 = vrot.slane %v347_v54, 2 }
  0xc2   : > { %v349_v57 = vadd.s32 %v348_v56, %v347_v54 }
  0xc4   : > { %v350_v59 = vrot.slane %v349_v57, 1 }
  0xc6   : > { %v351_v60 = vadd.s32 %v350_v59, %v349_v57 }
  0xc8   : > { %546 = vpush %v351_v60 }
  0xc9   : > { %548 = vpush %v365_v61 }
  0xf9   : > { %s547_s7 = spop %546 }
  0xfa   : > { %v353_v62 = vstv %s547_s7  ;;  %s549_s11 = spop %548 }
  0xfb   : > { %355 = vst.msk [vmem:[%s281_s6] sm:$0x1] %vm354_vm6, %v353_v62  ;;  %v367_v63 = vstv %s549_s11 }
  0xfc   : > { %368 = vst.msk [vmem:[%s287_s10] sm:$0x1] %vm354_vm6, %v367_v63 }
  0xfd PF: > { %s15_s17 = sadd.s32 1, %s607_s17   ;;  %s692_s15 = smov %s603_s16 }
  0xfe   : > { %p12_p5 = scmp.ge.s32.totalorder %s15_s17, 4   ;;  %s693_s16 = smov %s695_s18 }
 0x100   :  { %14 = sbr.rel (!%p12_p5) target bundleno = 2 (0x2), region = 88 }

</bundles_post_ra>
